<compile_context>
chip_gen: v5e
topology: v5e:2x2
jax: 0.10.0
libtpu: 0.0.40
codegen_flags: <defaults>
</compile_context>

<pallas_src>
import functools

import jax
import jax.numpy as jnp
from jax.experimental import pallas as pl
from jax.experimental.pallas import tpu as pltpu


def _cdiv(a, b):
    return -(-a // b)


def _round_up(x, m):
    return _cdiv(x, m) * m


def _mlp_kernel(x_ref, w1_ref, b1_ref, w2_ref, b2_ref, w3_ref, b3_ref, o_ref,
                *, tb, rpg, h2w):
    # In-kernel f32 -> bf16 cast (rides a VPU slot; no separate HBM cast pass).
    xb = x_ref[...].astype(jnp.bfloat16)                       # (rows, din)

    # Layer 1 (both packed nodes at once): MXU f32 accumulation, bias + tanh
    # in bf16.
    z1 = jnp.dot(xb, w1_ref[...], preferred_element_type=jnp.float32)
    h1 = jnp.tanh(z1.astype(jnp.bfloat16) + b1_ref[...])       # (rows, h1w) bf16

    # Layer 2.
    z2 = jnp.dot(h1, w2_ref[...], preferred_element_type=jnp.float32)
    h2 = jnp.tanh(z2.astype(jnp.bfloat16) + b2_ref[...])       # (rows, h2w) bf16

    # Per-graph node sum, accumulated in f32.  The 1/N scale (and, in the
    # packed layout, the even/odd half add) is folded into w3.
    s = jnp.sum(h2.astype(jnp.float32).reshape(tb, rpg, h2w), axis=1)

    # Graph-level readout: lane-dense 128-wide (10 real logits + zero pad),
    # bias-add and final tanh in f32.
    z3 = jnp.dot(s.astype(jnp.bfloat16), w3_ref[...],
                 preferred_element_type=jnp.float32) + b3_ref[...]
    o_ref[...] = jnp.tanh(z3)                                  # (tb, 128) f32


def mlp_net(x, params, *, rows_per_step=4096):
    """x: (B, N, 64) float32 -> (B, 10) float32."""
    B, N, D = x.shape
    w1, b1, w2, b2, w3, b3 = params
    H1 = w1.shape[1]          # 128
    H2 = w2.shape[1]          # 64
    C = w3.shape[1]           # 10
    C_PAD = 128               # lane-dense readout width

    bf16 = jnp.bfloat16
    inv_n = 1.0 / N

    # ---- 2-node packing with block-diagonal weights ------------------------
    # A K=64 / N=128 matmul occupies ~1/8 of the 256-wide MXU on v6e/v7x;
    # packing 2 nodes per row halves the LHS row count (and MXU pushes).
    pack = (N % 2 == 0)
    if pack:
        rpg = N // 2                              # packed rows per graph
        din, h1w, h2w = 2 * D, 2 * H1, 2 * H2     # 128, 256, 128
        w1k = (jnp.zeros((din, h1w), jnp.float32)
               .at[:D, :H1].set(w1).at[D:, H1:].set(w1)).astype(bf16)
        w2k = (jnp.zeros((h1w, h2w), jnp.float32)
               .at[:H1, :H2].set(w2).at[H1:, H2:].set(w2)).astype(bf16)
        b1k = jnp.concatenate([b1, b1], axis=1).astype(bf16)
        b2k = jnp.concatenate([b2, b2], axis=1).astype(bf16)
        # Readout: 10 -> 128 zero-padded lanes, stacked over both 64-lane
        # halves of the packed node sum, pre-scaled by 1/N.
        w3_half = jnp.zeros((H2, C_PAD), jnp.float32).at[:, :C].set(w3 * inv_n)
        w3k = jnp.concatenate([w3_half, w3_half], axis=0).astype(bf16)
    else:
        # TODO(synk): odd node counts fall back to the unpacked layout.
        rpg = N
        din, h1w, h2w = D, H1, H2
        w1k, w2k = w1.astype(bf16), w2.astype(bf16)
        b1k, b2k = b1.astype(bf16), b2.astype(bf16)
        w3k = (jnp.zeros((H2, C_PAD), jnp.float32)
               .at[:, :C].set(w3 * inv_n)).astype(bf16)
    b3k = jnp.zeros((1, C_PAD), jnp.float32).at[:, :C].set(b3)

    # ---- balanced batch tiling ---------------------------------------------
    tb_cap = max(8, _round_up(rows_per_step // rpg, 8))    # graphs/step cap
    nsteps = _cdiv(B, tb_cap)
    if nsteps < 4:
        # Small/medium batches: up to 4 steps of >=8 graphs each so the
        # "parallel" axis can shard across v7x's 2 TensorCores and the
        # pipeline overlaps DMA with compute.
        nsteps = max(1, min(4, _cdiv(B, 8)))
    if nsteps == 1:
        tb = B                        # exact single block: zero padding
    else:
        tb = _round_up(_cdiv(B, nsteps), 8)
        nsteps = _cdiv(B, tb)         # re-balance after rounding
    b_pad = nsteps * tb
    rows = tb * rpg                   # activation rows per grid step

    # Free contiguous reshape: no HBM pass over x, no cast, no pad.  If
    # b_pad > B the trailing block is a Pallas-masked partial block whose
    # (unspecified) rows only feed padded output graphs that are sliced off.
    x_flat = x.reshape(B * rpg, din)

    kernel = functools.partial(_mlp_kernel, tb=tb, rpg=rpg, h2w=h2w)
    const = lambda *shape: pl.BlockSpec(shape, lambda i: (0,) * len(shape))

    out = pl.pallas_call(
        kernel,
        out_shape=jax.ShapeDtypeStruct((b_pad, C_PAD), jnp.float32),
        grid_spec=pltpu.PrefetchScalarGridSpec(
            num_scalar_prefetch=0,
            grid=(nsteps,),
            in_specs=[
                pl.BlockSpec((rows, din), lambda i: (i, 0)),  # activations (f32)
                const(din, h1w),    # w1 block-diag (bf16) — VMEM resident
                const(1, h1w),      # b1 (bf16)
                const(h1w, h2w),    # w2 block-diag (bf16)
                const(1, h2w),      # b2 (bf16)
                const(h2w, C_PAD),  # w3 stacked, /N, zero-padded (bf16)
                const(1, C_PAD),    # b3 zero-padded (f32)
            ],
            out_specs=pl.BlockSpec((tb, C_PAD), lambda i: (i, 0)),
        ),
        compiler_params=pltpu.CompilerParams(
            dimension_semantics=("parallel",),
            vmem_limit_bytes=64 * 1024 * 1024,
        ),
    )(x_flat, w1k, b1k, w2k, b2k, w3k, b3k)

    return out[:B, :C]


def init_params(key):
    """Deterministic init; PyTorch Linear W is (out,in), kept transposed."""
    k1, k2, k3 = jax.random.split(key, 3)
    D, H1, H2, C = 64, 128, 64, 10

    def uniform(k, shape, fan_in):
        bound = 1.0 / jnp.sqrt(fan_in)
        return jax.random.uniform(k, shape, jnp.float32, -bound, bound)

    w1 = uniform(k1, (D, H1), D)
    b1 = uniform(jax.random.fold_in(k1, 1), (1, H1), D)
    w2 = uniform(k2, (H1, H2), H1)
    b2 = uniform(jax.random.fold_in(k2, 1), (1, H2), H1)
    w3 = uniform(k3, (H2, C), H2)
    b3 = uniform(jax.random.fold_in(k3, 1), (1, C), H2)
    return (w1, b1, w2, b2, w3, b3)


def mlp_net_ref_bf16(x, params):
    """Reference mirroring the kernel numerics (bf16 matmul operands + bf16
    bias/tanh for the hidden layers, f32 accumulation and readout)."""
    w1, b1, w2, b2, w3, b3 = params
    bf = lambda a: a.astype(jnp.bfloat16)
    z1 = jnp.dot(bf(x), bf(w1), preferred_element_type=jnp.float32)
    h1 = jnp.tanh(bf(z1) + bf(b1))
    z2 = jnp.dot(h1, bf(w2), preferred_element_type=jnp.float32)
    h2 = jnp.tanh(bf(z2) + bf(b2))
    m = jnp.mean(h2.astype(jnp.float32), axis=1)
    z3 = jnp.dot(bf(m), bf(w3), preferred_element_type=jnp.float32) + b3
    return jnp.tanh(z3)


def mlp_net_ref_f32(x, params):
    """Pure f32 reference of the original module semantics."""
    w1, b1, w2, b2, w3, b3 = params
    h1 = jnp.tanh(x @ w1 + b1)
    h2 = jnp.tanh(h1 @ w2 + b2)
    m = h2.mean(axis=1)
    return jnp.tanh(m @ w3 + b3)


if __name__ == "__main__":
    key = jax.random.PRNGKey(0)
    kx, kp = jax.random.split(key)

    B, N, D = 2, 8, 64   # batch=2 graphs, 8 nodes each, 64 input features
    x = jax.random.normal(kx, (B, N, D), jnp.float32)
    params = init_params(kp)

    run = jax.jit(mlp_net)
    out = jax.block_until_ready(run(x, params))
    assert out.shape == (B, 10)

    # Check against a reference mirroring the kernel's reduced precisions.
    ref_bf16 = mlp_net_ref_bf16(x, params)
    err_b = float(jnp.max(jnp.abs(out - ref_bf16)))
    assert err_b < 2e-2, f"bf16-mirror mismatch: max abs err {err_b}"

    # Loose check against the exact f32 module semantics.
    ref_f32 = mlp_net_ref_f32(x, params)
    err_f = float(jnp.max(jnp.abs(out - ref_f32)))
    assert err_f < 5e-2, f"f32 reference mismatch: max abs err {err_f}"

    print("KERNEL_OK")
</pallas_src>

<mosaic_0001>
module attributes {stable_mosaic.version = 11 : i64} {
  func.func @_mlp_kernel(%arg0: i32, %arg1: memref<8x128xf32, #tpu.memory_space<vmem>>, %arg2: memref<128x256xbf16, #tpu.memory_space<vmem>>, %arg3: memref<1x256xbf16, #tpu.memory_space<vmem>>, %arg4: memref<256x128xbf16, #tpu.memory_space<vmem>>, %arg5: memref<1x128xbf16, #tpu.memory_space<vmem>>, %arg6: memref<128x128xbf16, #tpu.memory_space<vmem>>, %arg7: memref<1x128xf32, #tpu.memory_space<vmem>>, %arg8: memref<2x128xf32, #tpu.memory_space<vmem>>) attributes {dimension_semantics = [#tpu.dimension_semantics<parallel>], iteration_bounds = array<i64: 1>, scalar_prefetch = 0 : i64, scratch_operands = 0 : i64, tpu.core_type = #tpu.core_type<tc>, window_params = [{transform_indices = @transform_0, window_bounds = array<i64: 8, 128>}, {pipeline_mode = #tpu.pipeline_mode<synchronous>, transform_indices = @transform_1, window_bounds = array<i64: 128, 256>}, {pipeline_mode = #tpu.pipeline_mode<synchronous>, transform_indices = @transform_2, window_bounds = array<i64: 1, 256>}, {pipeline_mode = #tpu.pipeline_mode<synchronous>, transform_indices = @transform_3, window_bounds = array<i64: 256, 128>}, {pipeline_mode = #tpu.pipeline_mode<synchronous>, transform_indices = @transform_4, window_bounds = array<i64: 1, 128>}, {pipeline_mode = #tpu.pipeline_mode<synchronous>, transform_indices = @transform_5, window_bounds = array<i64: 128, 128>}, {pipeline_mode = #tpu.pipeline_mode<synchronous>, transform_indices = @transform_6, window_bounds = array<i64: 1, 128>}, {transform_indices = @transform_7, window_bounds = array<i64: 2, 128>}]} {
    %c0 = arith.constant 0 : index
    %c0_0 = arith.constant 0 : index
    %0 = vector.load %arg1[%c0, %c0_0] : memref<8x128xf32, #tpu.memory_space<vmem>>, vector<8x128xf32>
    %1 = arith.truncf %0 : vector<8x128xf32> to vector<8x128xbf16>
    %c0_1 = arith.constant 0 : index
    %c0_2 = arith.constant 0 : index
    %2 = vector.load %arg2[%c0_1, %c0_2] : memref<128x256xbf16, #tpu.memory_space<vmem>>, vector<128x256xbf16>
    %cst = arith.constant dense<0.000000e+00> : vector<8x256xf32>
    %3 = tpu.matmul %1, %2, %cst {dimension_numbers = #tpu.dot_dimension_numbers<[1], [0], [0], [1], [0, 0, 1, 1], [], []>} : vector<8x128xbf16>, vector<128x256xbf16>, vector<8x256xf32> -> vector<8x256xf32>
    %4 = arith.truncf %3 : vector<8x256xf32> to vector<8x256xbf16>
    %c0_3 = arith.constant 0 : index
    %c0_4 = arith.constant 0 : index
    %5 = vector.load %arg3[%c0_3, %c0_4] : memref<1x256xbf16, #tpu.memory_space<vmem>>, vector<1x256xbf16>
    %6 = vector.broadcast %5 : vector<1x256xbf16> to vector<8x256xbf16>
    %7 = arith.addf %4, %6 : vector<8x256xbf16>
    %8 = math.tanh %7 : vector<8x256xbf16>
    %c0_5 = arith.constant 0 : index
    %c0_6 = arith.constant 0 : index
    %9 = vector.load %arg4[%c0_5, %c0_6] : memref<256x128xbf16, #tpu.memory_space<vmem>>, vector<256x128xbf16>
    %cst_7 = arith.constant dense<0.000000e+00> : vector<8x128xf32>
    %10 = tpu.matmul %8, %9, %cst_7 {dimension_numbers = #tpu.dot_dimension_numbers<[1], [0], [0], [1], [0, 0, 1, 1], [], []>} : vector<8x256xbf16>, vector<256x128xbf16>, vector<8x128xf32> -> vector<8x128xf32>
    %11 = arith.truncf %10 : vector<8x128xf32> to vector<8x128xbf16>
    %c0_8 = arith.constant 0 : index
    %c0_9 = arith.constant 0 : index
    %12 = vector.load %arg5[%c0_8, %c0_9] : memref<1x128xbf16, #tpu.memory_space<vmem>>, vector<1x128xbf16>
    %13 = vector.broadcast %12 : vector<1x128xbf16> to vector<8x128xbf16>
    %14 = arith.addf %11, %13 : vector<8x128xbf16>
    %15 = math.tanh %14 : vector<8x128xbf16>
    %16 = arith.extf %15 : vector<8x128xbf16> to vector<8x128xf32>
    %17 = vector.shape_cast %16 : vector<8x128xf32> to vector<2x4x128xf32>
    %cst_10 = arith.constant dense<0.000000e+00> : vector<2x128xf32>
    %18 = vector.multi_reduction <add>, %17, %cst_10 [1] : vector<2x4x128xf32> to vector<2x128xf32>
    %19 = arith.truncf %18 : vector<2x128xf32> to vector<2x128xbf16>
    %c0_11 = arith.constant 0 : index
    %c0_12 = arith.constant 0 : index
    %20 = vector.load %arg6[%c0_11, %c0_12] : memref<128x128xbf16, #tpu.memory_space<vmem>>, vector<128x128xbf16>
    %cst_13 = arith.constant dense<0.000000e+00> : vector<2x128xf32>
    %21 = tpu.matmul %19, %20, %cst_13 {dimension_numbers = #tpu.dot_dimension_numbers<[1], [0], [0], [1], [0, 0, 1, 1], [], []>} : vector<2x128xbf16>, vector<128x128xbf16>, vector<2x128xf32> -> vector<2x128xf32>
    %c0_14 = arith.constant 0 : index
    %c0_15 = arith.constant 0 : index
    %22 = vector.load %arg7[%c0_14, %c0_15] : memref<1x128xf32, #tpu.memory_space<vmem>>, vector<1x128xf32>
    %23 = vector.broadcast %22 : vector<1x128xf32> to vector<2x128xf32>
    %24 = arith.addf %21, %23 : vector<2x128xf32>
    %25 = math.tanh %24 : vector<2x128xf32>
    %c0_16 = arith.constant 0 : index
    %c0_17 = arith.constant 0 : index
    %26 = vector.load %arg8[%c0_16, %c0_17] : memref<2x128xf32, #tpu.memory_space<vmem>>, vector<2x128xf32>
    tpu.vector_store %arg8[%c0_16, %c0_17], %25 {strides = array<i32>} : memref<2x128xf32, #tpu.memory_space<vmem>>, vector<2x128xf32>,
    return
  }
  func.func @transform_0(%arg0: i32) -> (i32, i32) {
    %c0_i32 = arith.constant 0 : i32
    %c0_i32_0 = arith.constant 0 : i32
    return %arg0, %c0_i32 : i32, i32
  }
  func.func @transform_1(%arg0: i32) -> (i32, i32) {
    %c0_i32 = arith.constant 0 : i32
    %c0_i32_0 = arith.constant 0 : i32
    %c0_i32_1 = arith.constant 0 : i32
    return %c0_i32, %c0_i32_0 : i32, i32
  }
  func.func @transform_2(%arg0: i32) -> (i32, i32) {
    %c0_i32 = arith.constant 0 : i32
    %c0_i32_0 = arith.constant 0 : i32
    %c0_i32_1 = arith.constant 0 : i32
    return %c0_i32, %c0_i32_0 : i32, i32
  }
  func.func @transform_3(%arg0: i32) -> (i32, i32) {
    %c0_i32 = arith.constant 0 : i32
    %c0_i32_0 = arith.constant 0 : i32
    %c0_i32_1 = arith.constant 0 : i32
    return %c0_i32, %c0_i32_0 : i32, i32
  }
  func.func @transform_4(%arg0: i32) -> (i32, i32) {
    %c0_i32 = arith.constant 0 : i32
    %c0_i32_0 = arith.constant 0 : i32
    %c0_i32_1 = arith.constant 0 : i32
    return %c0_i32, %c0_i32_0 : i32, i32
  }
  func.func @transform_5(%arg0: i32) -> (i32, i32) {
    %c0_i32 = arith.constant 0 : i32
    %c0_i32_0 = arith.constant 0 : i32
    %c0_i32_1 = arith.constant 0 : i32
    return %c0_i32, %c0_i32_0 : i32, i32
  }
  func.func @transform_6(%arg0: i32) -> (i32, i32) {
    %c0_i32 = arith.constant 0 : i32
    %c0_i32_0 = arith.constant 0 : i32
    %c0_i32_1 = arith.constant 0 : i32
    return %c0_i32, %c0_i32_0 : i32, i32
  }
  func.func @transform_7(%arg0: i32) -> (i32, i32) {
    %c0_i32 = arith.constant 0 : i32
    %c0_i32_0 = arith.constant 0 : i32
    return %arg0, %c0_i32 : i32, i32
  }
}

</mosaic_0001>

<bundles_post_ra>
// kernel: mlp_net.1
= control target key start
LH: loop header
LB: loop body
LE: loop exit
PB: predicated region body
PF: predicated region fallthrough
CT: control target
= control target key end

     0   :  { %s932_s0 = inlined_call_operand.vmem [shape: f32[8,128], index: 0, kind: input, shape index: {}]   ;;  %s933_s1 = inlined_call_operand.vmem [shape: bf16[128,256], index: 1, kind: input, shape index: {}]   ;;  %s934_s2 = inlined_call_operand.vmem [shape: bf16[1,256], index: 2, kind: input, shape index: {}]   ;;  %s935_s3 = inlined_call_operand.vmem [shape: bf16[256,128], index: 3, kind: input, shape index: {}]   ;;  %s936_s4 = inlined_call_operand.vmem [shape: bf16[1,128], index: 4, kind: input, shape index: {}]   ;;  %s937_s5 = inlined_call_operand.vmem [shape: bf16[128,128], index: 5, kind: input, shape index: {}]   ;;  %s938_s6 = inlined_call_operand.vmem [shape: f32[1,128], index: 6, kind: input, shape index: {}]   ;;  %s939_s7 = inlined_call_operand.hbm [shape: f32[2,128], index: 7, kind: output, shape index: {}]  }
   0x1   :  { %v530_v0 = vld [vmem:[%s933_s1 + $0x70] sm:$0xf]  ;;  %v647_v1 = vld [vmem:[%s933_s1 + $0x74] sm:$0xf0]  ;;  %v646_v2 = vld [vmem:[%s933_s1 + $0x74] sm:$0xf] }
   0x2   :  { %v531_v3 = vor.u32 %v647_v1, %v530_v0  ;;  %v532_v4 = vld [vmem:[%s933_s1 + $0x78] sm:$0xf0]  ;;  %v522_v5 = vld [vmem:[%s933_s1 + $0x60] sm:$0xf]  ;;  %v645_v6 = vld [vmem:[%s933_s1 + $0x64] sm:$0xf0] }
   0x3   :  { %v535_v7 = vor.u32 %v646_v2, %v532_v4  ;;  %v644_v8 = vld [vmem:[%s933_s1 + $0x64] sm:$0xf]  ;;  %v524_v9 = vld [vmem:[%s933_s1 + $0x68] sm:$0xf0]  ;;  %v523_v10 = vor.u32 %v645_v6, %v522_v5  ;;  %v514_v12 = vld [vmem:[%s933_s1 + $0x50] sm:$0xf] }
   0x4   :  { %125 = vmatpush.bf16.msra.mxu0 %v531_v3  ;;  %v527_v11 = vor.u32 %v644_v8, %v524_v9  ;;  %v643_v13 = vld [vmem:[%s933_s1 + $0x54] sm:$0xf0]  ;;  %v642_v14 = vld [vmem:[%s933_s1 + $0x54] sm:$0xf]  ;;  %v516_v15 = vld [vmem:[%s933_s1 + $0x58] sm:$0xf0] }
   0x5   :  { %138 = vmatpush.bf16.msra.mxu1 %v535_v7  ;;  %v515_v16 = vor.u32 %v643_v13, %v514_v12  ;;  %v519_v17 = vor.u32 %v642_v14, %v516_v15  ;;  %v506_v18 = vld [vmem:[%s933_s1 + $0x40] sm:$0xf]  ;;  %v641_v19 = vld [vmem:[%s933_s1 + $0x44] sm:$0xf0]  ;;  %v640_v20 = vld [vmem:[%s933_s1 + $0x44] sm:$0xf] }
   0x6   :  { %v508_v21 = vld [vmem:[%s933_s1 + $0x48] sm:$0xf0]  ;;  %v498_v22 = vld [vmem:[%s933_s1 + $0x30] sm:$0xf]  ;;  %v507_v23 = vor.u32 %v641_v19, %v506_v18  ;;  %v639_v24 = vld [vmem:[%s933_s1 + $0x34] sm:$0xf0] }
   0x7   :  { %v655_v25 = vld [vmem:[%s935_s3 + $0x38] sm:$0xff]  ;;  %v511_v27 = vor.u32 %v640_v20, %v508_v21  ;;  %v638_v28 = vld [vmem:[%s933_s1 + $0x34] sm:$0xf] }
   0x8   :  { %126 = vmatpush.bf16.msra.mxu0 %v523_v10  ;;  %v663_v26 = vld [vmem:[%s935_s3 + $0x78] sm:$0xff]  ;;  %v654_v30 = vld [vmem:[%s935_s3 + $0x30] sm:$0xff]  ;;  %305 = vmatpush.bf16.msra.mxu2 %v655_v25 }
   0x9   :  { %139 = vmatpush.bf16.msra.mxu1 %v527_v11  ;;  %v500_v29 = vld [vmem:[%s933_s1 + $0x38] sm:$0xf0]  ;;  %318 = vmatpush.bf16.msra.mxu3 %v663_v26  ;;  %v662_v31 = vld [vmem:[%s935_s3 + $0x70] sm:$0xff] }
   0xc   :  { %127 = vmatpush.bf16.msra.mxu0 %v515_v16 }
   0xd   :  { %140 = vmatpush.bf16.msra.mxu1 %v519_v17 }
   0xe   :  { %12 = vsyncpa [#allocation3], 0  ;;  %v499_v32 = vor.u32 %v639_v24, %v498_v22  ;;  %v503_v33 = vor.u32 %v638_v28, %v500_v29  ;;  %v490_v34 = vld [vmem:[%s933_s1 + $0x20] sm:$0xf]  ;;  %v637_v35 = vld [vmem:[%s933_s1 + $0x24] sm:$0xf0]  ;;  %306 = vmatpush.bf16.msra.mxu2 %v654_v30  ;;  %319 = vmatpush.bf16.msra.mxu3 %v662_v31 }
   0xf   :  { %v636_v36 = vld [vmem:[%s933_s1 + $0x24] sm:$0xf]  ;;  %v492_v37 = vld [vmem:[%s933_s1 + $0x28] sm:$0xf0]  ;;  %v491_v40 = vor.u32 %v637_v35, %v490_v34  ;;  %v482_v42 = vld [vmem:[%s933_s1 + $0x10] sm:$0xf] }
  0x10   :  { %128 = vmatpush.bf16.msra.mxu0 %v507_v23  ;;  %v653_v38 = vld [vmem:[%s935_s3 + $0x28] sm:$0xff]  ;;  %v495_v41 = vor.u32 %v636_v36, %v492_v37  ;;  %v635_v43 = vld [vmem:[%s933_s1 + $0x14] sm:$0xf0]  ;;  %v634_v44 = vld [vmem:[%s933_s1 + $0x14] sm:$0xf]  ;;  %vm348_vm0 = vcmask 1043456  }
  0x11   :  { %141 = vmatpush.bf16.msra.mxu1 %v511_v27  ;;  %v661_v39 = vld [vmem:[%s935_s3 + $0x68] sm:$0xff]  ;;  %v484_v45 = vld [vmem:[%s933_s1 + $0x18] sm:$0xf0]  ;;  %v483_v46 = vor.u32 %v635_v43, %v482_v42  ;;  %v474_v48 = vld [vmem:[%s933_s1] sm:$0xf]  ;;  %vm389_vm1 = vcmask 1041409  }
  0x12   :  { %307 = vmatpush.bf16.msra.mxu2 %v653_v38  ;;  %320 = vmatpush.bf16.msra.mxu3 %v661_v39  ;;  %v487_v47 = vor.u32 %v634_v44, %v484_v45  ;;  %v633_v49 = vld [vmem:[%s933_s1 + $0x4] sm:$0xf0]  ;;  %v632_v50 = vld [vmem:[%s933_s1 + $0x4] sm:$0xf]  ;;  %v476_v51 = vld [vmem:[%s933_s1 + $0x8] sm:$0xf0] }
  0x13   :  { %v475_v52 = vor.u32 %v633_v49, %v474_v48  ;;  %v27_v53 = vld [vmem:[%s932_s0] sm:$0xff]  ;;  %v479_v54 = vor.u32 %v632_v50, %v476_v51  ;;  %v651_v59 = vld [vmem:[%s935_s3 + $0x18] sm:$0xff]  ;;  %v650_v61 = vld [vmem:[%s935_s3 + $0x10] sm:$0xff]  ;;  %s708_s20 = smov [#allocation2]   ;;  %s463_s24 = sshll.u32 %s939_s7, 4  ;;  %s464_s24 = int_to_ptr.hbm [resolvable:$true] %s463_s24 }
  0x14   :  { %129 = vmatpush.bf16.msra.mxu0 %v499_v32  ;;  %v28_v55 = vpack.c.bf16 %v27_v53, %v27_v53  ;;  %v152_v56 = vld [vmem:[%s934_s2] sm:$0x3]  ;;  %v659_v60 = vld [vmem:[%s935_s3 + $0x58] sm:$0xff]  ;;  %v658_v62 = vld [vmem:[%s935_s3 + $0x50] sm:$0xff]  ;;  %s461_s21 = sshll.u32 %s708_s20, 4  ;;  %s462_s21 = int_to_ptr.vmem [resolvable:$true] %s461_s21 }
  0x15   :  { %142 = vmatpush.bf16.msra.mxu1 %v503_v33  ;;  %154 = vst [vmem:[#allocation1] ss:$9 sm:$0xff] %v152_v56  ;;  %v652_v57 = vld [vmem:[%s935_s3 + $0x20] sm:$0xff]  ;;  %v649_v63 = vld [vmem:[%s935_s3 + $0x8] sm:$0xff]  ;;  %v671_v28 = vld [vmem:[%s937_s5 + $0x38] sm:$0xff] }
  0x16   :  { %v660_v58 = vld [vmem:[%s935_s3 + $0x60] sm:$0xff]  ;;  %308 = vmatpush.bf16.msra.mxu2 %v652_v57  ;;  %v657_v0 = vld [vmem:[%s935_s3 + $0x48] sm:$0xff]  ;;  %v670_v29 = vld [vmem:[%s937_s5 + $0x30] sm:$0xff] }
  0x17   :  { %321 = vmatpush.bf16.msra.mxu3 %v660_v58  ;;  %v648_v1 = vld [vmem:[%s935_s3] sm:$0xff]  ;;  %v669_v30 = vld [vmem:[%s937_s5 + $0x28] sm:$0xff]  ;;  %v667_v34 = vld [vmem:[%s937_s5 + $0x18] sm:$0xff] }
  0x18   :  { %130 = vmatpush.bf16.msra.mxu0 %v491_v40  ;;  %v656_v2 = vld [vmem:[%s935_s3 + $0x40] sm:$0xff]  ;;  %v666_v37 = vld [vmem:[%s937_s5 + $0x10] sm:$0xff]  ;;  %v665_v42 = vld [vmem:[%s937_s5 + $0x8] sm:$0xff] }
  0x19   :  { %143 = vmatpush.bf16.msra.mxu1 %v495_v41  ;;  %v332_v31 = vld [vmem:[%s936_s4] sm:$0x1] }
  0x1a   :  { %309 = vmatpush.bf16.msra.mxu2 %v651_v59  ;;  %v668_v32 = vld [vmem:[%s937_s5 + $0x20] sm:$0xff]  ;;  %v334_v33 = vpack.i.b16 %v332_v31, %v332_v31 }
  0x1b   :  { %322 = vmatpush.bf16.msra.mxu3 %v659_v60 }
  0x1c   :  { %131 = vmatpush.bf16.msra.mxu0 %v483_v46  ;;  %v155_v3 = vld [vmem:[#allocation1] sm:$0xff]  ;;  %v156_v4 = vld [vmem:[#allocation1 + $0x9] sm:$0xff]  ;;  %v336_v36 = vperm.slane %v334_v33, 0 }
  0x1d   :  { %144 = vmatpush.bf16.msra.mxu1 %v487_v47  ;;  %v157_v5 = vpack.i.b16 %v155_v3, %v155_v3  ;;  %v160_v6 = vpack.i.b16 %v156_v4, %v156_v4  ;;  %v664_v46 = vld [vmem:[%s937_s5] sm:$0xff] }
  0x1e   :  { %310 = vmatpush.bf16.msra.mxu2 %v650_v61  ;;  %v338_v41 = vunpack.c.l.bf16 %v336_v36 }
  0x1f   :  { %323 = vmatpush.bf16.msra.mxu3 %v658_v62  ;;  %v159_v7 = vperm.slane %v157_v5, 0  ;;  %v162_v8 = vperm.slane %v160_v6, 0 }
  0x20   :  { %132 = vmatpush.bf16.msra.mxu0 %v475_v52 }
  0x21   :  { %145 = vmatpush.bf16.msra.mxu1 %v479_v54  ;;  %v165_v12 = vunpack.c.l.bf16 %v159_v7  ;;  %v166_v13 = vunpack.c.l.bf16 %v162_v8 }
  0x22   :  { %311 = vmatpush.bf16.msra.mxu2 %v649_v63 }
  0x23   :  { %133 = vmatmul.bf16.vlgmr.msra.gmra.mxu0 %v28_v55  ;;  %324 = vmatpush.bf16.msra.mxu3 %v657_v0 }
  0x24   :  { %146 = vmatmul.bf16.vlgmr.msra.gmra.mxu1 %v28_v55  ;;  %441 = vmatpush.bf16.msrb.mxu0 %v671_v28 }
  0x26   :  { %312 = vmatpush.bf16.msra.mxu2 %v648_v1 }
  0x27   :  { %325 = vmatpush.bf16.msra.mxu3 %v656_v2 }
  0x28   :  { %442 = vmatpush.bf16.msrb.mxu0 %v670_v29 }
  0x2c   :  { %443 = vmatpush.bf16.msrb.mxu0 %v669_v30 }
  0x30   :  { %444 = vmatpush.bf16.msrb.mxu0 %v668_v32 }
  0x34   :  { %445 = vmatpush.bf16.msrb.mxu0 %v667_v34 }
  0x38   :  { %446 = vmatpush.bf16.msrb.mxu0 %v666_v37 }
  0x3c   :  { %447 = vmatpush.bf16.msrb.mxu0 %v665_v42 }
  0x40   :  { %448 = vmatpush.bf16.msrb.mxu0 %v664_v46 }
  0xa0   :  { %v134_v9 = vpop.f32.mrf.mxu0 }
  0xa1   :  { %v147_v10 = vpop.f32.mrf.mxu1 }
  0xa2   :  { %v151_v11 = vpack.c.bf16 %v147_v10, %v134_v9  ;;  %v673_v10 = vld [vmem:[%s938_s6] ss:$0 sm:$0xff] }
  0xa4   :  { %v163_v14 = vunpack.c.l.bf16 %v151_v11  ;;  %v164_v15 = vunpack.c.h.bf16 %v151_v11 }
  0xa6   :  { %v167_v16 = vadd.f32 %v165_v12, %v163_v14  ;;  %v168_v17 = vadd.f32 %v166_v13, %v164_v15 }
  0xa8   :  { %v136_v18 = vpop.f32.mrf.mxu0  ;;  %v169_v19 = vpack.c.bf16 %v167_v16, %v167_v16  ;;  %v170_v20 = vpack.c.bf16 %v168_v17, %v168_v17 }
  0xa9   :  { %v149_v21 = vpop.f32.mrf.mxu1 }
  0xaa   :  { %v171_v22 = vunpack.c.l.bf16 %v169_v19  ;;  %v172_v23 = vunpack.c.l.bf16 %v170_v20 }
  0xac   :  { %674 = vtanh.f32 %v171_v22 }
  0xad   :  { %676 = vtanh.f32 %v172_v23 }
  0xb2   :  { %v675_v24 = vpop.eup %674 }
  0xb3   :  { %v677_v25 = vpop.eup %676  ;;  %v175_v26 = vpack.c.bf16 %v675_v24, %v675_v24 }
  0xb4   :  { %v176_v27 = vpack.c.bf16 %v677_v25, %v677_v25 }
  0xb5   :  { %313 = vmatmul.bf16.vlgmr.msra.gmra.mxu2 %v175_v26 }
  0xb6   :  { %326 = vmatmul.bf16.vlgmr.msra.gmra.mxu3 %v176_v27 }
 0x138   :  { %v314_v35 = vpop.f32.mrf.mxu2 }
 0x139   :  { %v327_v38 = vpop.f32.mrf.mxu3 }
 0x13a   :  { %v328_v39 = vadd.f32 %v327_v38, %v314_v35 }
 0x13c   :  { %v331_v40 = vpack.c.bf16 %v328_v39, %v328_v39 }
 0x13e   :  { %v337_v43 = vunpack.c.l.bf16 %v331_v40 }
 0x140   :  { %v339_v44 = vadd.f32 %v338_v41, %v337_v43  ;;  %v316_v45 = vpop.f32.mrf.mxu2 }
 0x141   :  { %v329_v47 = vpop.f32.mrf.mxu3 }
 0x142   :  { %v340_v48 = vpack.c.bf16 %v339_v44, %v339_v44 }
 0x144   :  { %v341_v49 = vunpack.c.l.bf16 %v340_v48 }
 0x146   :  { %678 = vtanh.f32 %v341_v49 }
 0x14c   :  { %v679_v50 = vpop.eup %678 }
 0x14d   :  { %v343_v51 = vpack.c.bf16 %v679_v50, %v679_v50 }
 0x14f   :  { %v344_v52 = vunpack.c.l.bf16 %v343_v51 }
 0x151   :  { %v346_v53 = vrot.slane %v344_v52, 4  ;;  %v349_v54 = vsel %vm348_vm0, %v344_v52, 0.0 }
 0x152   :  { %v350_v55 = vrot.slane %v349_v54, 4 }
 0x153   :  { %v356_v56 = vsel %vm348_vm0, %v346_v53, 0.0 }
 0x154   :  { %v351_v57 = vadd.f32 %v350_v55, %v349_v54  ;;  %v357_v58 = vrot.slane %v356_v56, 4 }
 0x156   :  { %v352_v59 = vrot.slane %v351_v57, 2  ;;  %v358_v60 = vadd.f32 %v357_v58, %v356_v56 }
 0x158   :  { %v353_v61 = vadd.f32 %v352_v59, %v351_v57  ;;  %v359_v62 = vrot.slane %v358_v60, 2 }
 0x15a   :  { %v354_v63 = vrot.slane %v353_v61, 1  ;;  %v360_v0 = vadd.f32 %v359_v62, %v358_v60 }
 0x15c   :  { %v355_v1 = vadd.f32 %v354_v63, %v353_v61  ;;  %v361_v2 = vrot.slane %v360_v0, 1 }
 0x15e   :  { %v362_v3 = vadd.f32 %v361_v2, %v360_v0  ;;  %v363_v4 = vpack.c.bf16 %v355_v1, %v355_v1 }
 0x160   :  { %v364_v5 = vpack.c.bf16 %v362_v3, %v362_v3  ;;  %v387_v6 = vunpack.c.l.b16 %v363_v4 }
 0x162   :  { %v388_v7 = vunpack.c.l.b16 %v364_v5 }
 0x164   :  { %v390_v8 = vsel %vm389_vm1, %v388_v7, %v387_v6 }
 0x165   :  { %v391_v9 = vpack.c.b16 %v390_v8, %v390_v8 }
 0x167   :  { %449 = vmatmul.bf16.vlgmr.msrb.gmra.mxu0 %v391_v9 }
 0x1e4   :  { %v450_v11 = vpop.f32.mrf.mxu0 }
 0x1e5   :  { %v451_v12 = vadd.f32 %v673_v10, %v450_v11 }
 0x1e7   :  { %680 = vtanh.f32 %v451_v12 }
 0x1ec   :  { %v452_v13 = vpop.f32.mrf.mxu0 }
 0x1ed   :  { %v681_v14 = vpop.eup %680 }
 0x1ee   :  { %455 = vst [vmem:[#allocation2] sm:$0x3] %v681_v14 }
 0x1ef   :  { %466 = dma.vmem_to_hbm [thread:$0]  %s462_s21, 32, %s464_s24, [#allocation3]  }
 0x1f0   :  { %706 = dma.done.wait [#allocation3], 32  }
 0x1f1   :  { %707 = vsyncadd [#allocation3], 4294967264 }
 0x1f2   :  { %471 = vsyncpa [#allocation3], 1 }

</bundles_post_ra>
